<compile_context>
chip_gen: v7x
topology: tpu7x:2x2x1
jax: 0.10.0
libtpu: 0.0.40
codegen_flags: <defaults>
</compile_context>

<pallas_src>
import functools

import jax
import jax.numpy as jnp
from jax.experimental import pallas as pl
from jax.experimental.pallas import tpu as pltpu


def _round_up(x: int, m: int) -> int:
    return ((x + m - 1) // m) * m


# --------------------------------------------------------------------------
# Kernels
# --------------------------------------------------------------------------

def _linear_kernel_single(x_ref, w_ref, b_ref, o_ref):
    # x_ref: (TM, K) in x dtype | w_ref: (K, NP) bf16 | b_ref: (1, NP) f32
    # o_ref: (TM, NP) in output dtype.  Whole K in one MXU dot, f32 accumulate,
    # bias added in f32 (safe on v5e: no bf16 VPU), cast once on the way out.
    x = x_ref[...].astype(jnp.bfloat16)
    acc = jnp.dot(x, w_ref[...], preferred_element_type=jnp.float32)
    o_ref[...] = (acc + b_ref[...]).astype(o_ref.dtype)


def _linear_kernel_ksplit(x_ref, w_ref, b_ref, o_ref, acc_ref):
    # Fallback when K does not fit VMEM in one block.
    # acc_ref: (TM, NP) f32 scratch, persists across the (last) k grid axis.
    k = pl.program_id(1)

    @pl.when(k == 0)
    def _():
        # Fold the bias into the init -> no epilogue add.
        acc_ref[...] = jnp.broadcast_to(b_ref[...], acc_ref.shape)

    acc_ref[...] += jnp.dot(x_ref[...].astype(jnp.bfloat16), w_ref[...],
                            preferred_element_type=jnp.float32)

    @pl.when(k == pl.num_programs(1) - 1)
    def _():
        o_ref[...] = acc_ref[...].astype(o_ref.dtype)


# --------------------------------------------------------------------------
# Parameter prep (done ONCE, hoisted out of the per-call path)
# --------------------------------------------------------------------------

def prepare_params(w_t, b):
    """Pad to (K_pad, OUTP_pad) multiples of 128 and cast W to bf16, once.

    w_t: (inp, outp) = PyTorch nn.Linear weight, pre-transposed.
    b:   (outp,)
    """
    k, outp = w_t.shape
    k_pad = _round_up(k, 128)
    outp_pad = _round_up(outp, 128)
    w_p = jnp.zeros((k_pad, outp_pad), jnp.bfloat16).at[:k, :outp].set(
        w_t.astype(jnp.bfloat16))
    b_p = jnp.zeros((1, outp_pad), jnp.float32).at[0, :outp].set(
        b.astype(jnp.float32))
    return w_p, b_p


# --------------------------------------------------------------------------
# Forward
# --------------------------------------------------------------------------

@functools.partial(jax.jit, static_argnames=("outp", "vmem_budget_bytes"))
def classifier_forward(x_nchw, w_p, b_p, *, outp,
                       vmem_budget_bytes=20 * 1024 * 1024):
    """Flatten + Linear with pre-prepared (padded, bf16) params."""
    n = x_nchw.shape[0]
    x_flat = x_nchw.reshape(n, -1)           # nn.Flatten()
    k = x_flat.shape[1]
    k_pad, outp_pad = w_p.shape
    out_dtype = x_nchw.dtype
    x_bytes = jnp.dtype(x_flat.dtype).itemsize
    out_bytes = jnp.dtype(out_dtype).itemsize

    # ---- row tile selection --------------------------------------------
    n8 = _round_up(n, 8)
    tm = min(512, n8)                         # roofline sweet spot for big N
    # Give v7x's second TensorCore at least 2 batch tiles when batch allows.
    if n8 >= 16 and n8 <= tm:
        tm = _round_up((n8 + 1) // 2, 8)

    def vmem_needed(tm_, tk_):
        return (2 * tm_ * tk_ * x_bytes          # x, double-buffered
                + 2 * tk_ * outp_pad * 2         # W (bf16), double-buffered
                + 2 * outp_pad * 4               # bias
                + 2 * tm_ * outp_pad * out_bytes  # output, double-buffered
                + tm_ * outp_pad * 4)            # acc scratch (worst case)

    # ---- K tile selection: collapse the reduction axis if it fits VMEM ----
    def pick_tk(tm_):
        n128 = k_pad // 128
        best = 0
        for d in range(1, n128 + 1):
            if n128 % d == 0 and vmem_needed(tm_, d * 128) <= vmem_budget_bytes:
                best = d
        return best * 128

    tk = pick_tk(tm)
    while tk == 0 and tm > 8:
        tm = max(8, _round_up(tm // 2, 8))
        tk = pick_tk(tm)
    if tk == 0:
        tk = 128  # last resort; vmem_limit below still gives headroom

    n_pad = _round_up(n8, tm)

    # ---- pad x only when needed (cheap single-axis pads; no dtype copy) ----
    pad_n, pad_k = n_pad - n, k_pad - k
    if pad_n or pad_k:
        x_flat = jnp.pad(x_flat, ((0, pad_n), (0, pad_k)))

    m_tiles = n_pad // tm

    if tk == k_pad:
        # Collapsed-K path: one dot per batch tile, no scratch, no pl.when.
        grid = (m_tiles,)
        kernel = _linear_kernel_single
        in_specs = [
            pl.BlockSpec((tm, k_pad), lambda i: (i, 0)),
            pl.BlockSpec((k_pad, outp_pad), lambda i: (0, 0)),
            pl.BlockSpec((1, outp_pad), lambda i: (0, 0)),
        ]
        out_specs = pl.BlockSpec((tm, outp_pad), lambda i: (i, 0))
        scratch_shapes = []
        dims = ("parallel",)
    else:
        # K-split path: reduction axis last, f32 accumulator scratch.
        grid = (m_tiles, k_pad // tk)
        kernel = _linear_kernel_ksplit
        in_specs = [
            pl.BlockSpec((tm, tk), lambda i, kk: (i, kk)),
            pl.BlockSpec((tk, outp_pad), lambda i, kk: (kk, 0)),
            pl.BlockSpec((1, outp_pad), lambda i, kk: (0, 0)),
        ]
        out_specs = pl.BlockSpec((tm, outp_pad), lambda i, kk: (i, 0))
        scratch_shapes = [pltpu.VMEM((tm, outp_pad), jnp.float32)]
        dims = ("parallel", "arbitrary")

    needed = vmem_needed(tm, tk)
    vmem_limit = int(min(max(needed + (4 << 20), 16 << 20), 48 << 20))

    out_pad = pl.pallas_call(
        kernel,
        out_shape=jax.ShapeDtypeStruct((n_pad, outp_pad), out_dtype),
        grid_spec=pltpu.PrefetchScalarGridSpec(
            num_scalar_prefetch=0,
            grid=grid,
            in_specs=in_specs,
            out_specs=out_specs,
            scratch_shapes=scratch_shapes,
        ),
        compiler_params=pltpu.CompilerParams(
            dimension_semantics=dims,
            vmem_limit_bytes=vmem_limit,
        ),
        cost_estimate=pl.CostEstimate(
            flops=2 * n_pad * k_pad * outp_pad,
            transcendentals=0,
            bytes_accessed=(n_pad * k_pad * x_bytes
                            + m_tiles * k_pad * outp_pad * 2
                            + outp_pad * 4
                            + n_pad * outp_pad * out_bytes),
        ),
    )(x_flat, w_p, b_p)

    # Static slice of padding only; dtype is already final (cast in-kernel).
    return out_pad[:n, :outp]


def reference_forward(x_nchw, w_t, b):
    n = x_nchw.shape[0]
    return x_nchw.reshape(n, -1) @ w_t + b[None, :]


if __name__ == "__main__":
    # Small shapes consistent with the module: batch=2, C=4, H=W=16
    # -> inp = 4*16*16 = 1024, outp = 10
    N, C, H, W = 2, 4, 16, 16
    INP = C * H * W
    OUTP = 10

    key = jax.random.PRNGKey(0)
    kx, kw, kb = jax.random.split(key, 3)

    x = jax.random.normal(kx, (N, C, H, W), dtype=jnp.float32)

    # nn.Linear-style init U(-1/sqrt(inp), 1/sqrt(inp)).  PyTorch stores the
    # weight as (outp, inp); we keep the pre-transposed (inp, outp) layout.
    bound = 1.0 / (INP ** 0.5)
    w_t = jax.random.uniform(kw, (INP, OUTP), dtype=jnp.float32,
                             minval=-bound, maxval=bound)
    b = jax.random.uniform(kb, (OUTP,), dtype=jnp.float32,
                           minval=-bound, maxval=bound)

    # Parameters padded / cast ONCE (hoisted out of the per-call path).
    w_p, b_p = prepare_params(w_t, b)

    out = classifier_forward(x, w_p, b_p, outp=OUTP)
    out = jax.block_until_ready(out)

    ref_f32 = reference_forward(x, w_t, b)
    # bf16-operand reference (same operand rounding, f32 accumulate).
    ref_bf16 = (jnp.dot(x.reshape(N, -1).astype(jnp.bfloat16),
                        w_t.astype(jnp.bfloat16),
                        preferred_element_type=jnp.float32) + b[None, :])

    assert out.shape == (N, OUTP)
    assert jnp.allclose(out, ref_bf16, atol=2e-3, rtol=2e-3)
    assert jnp.allclose(out, ref_f32, atol=2e-2, rtol=2e-2)

    # Also exercise the K-split accumulator fallback (force it with a tiny
    # VMEM budget) so both code paths are compiled and checked.
    out2 = classifier_forward(x, w_p, b_p, outp=OUTP,
                              vmem_budget_bytes=200 * 1024)
    out2 = jax.block_until_ready(out2)
    assert out2.shape == (N, OUTP)
    assert jnp.allclose(out2, ref_bf16, atol=2e-3, rtol=2e-3)
    assert jnp.allclose(out2, ref_f32, atol=2e-2, rtol=2e-2)

    print("KERNEL_OK")
</pallas_src>

<mosaic_0001>
module attributes {stable_mosaic.version = 11 : i64} {
  func.func @_linear_kernel_single(%arg0: i32, %arg1: memref<8x1024xf32, #tpu.memory_space<vmem>>, %arg2: memref<1024x128xbf16, #tpu.memory_space<vmem>>, %arg3: memref<1x128xf32, #tpu.memory_space<vmem>>, %arg4: memref<8x128xf32, #tpu.memory_space<vmem>>) attributes {dimension_semantics = [#tpu.dimension_semantics<parallel>], iteration_bounds = array<i64: 1>, scalar_prefetch = 0 : i64, scratch_operands = 0 : i64, tpu.core_type = #tpu.core_type<tc>, window_params = [{transform_indices = @transform_0, window_bounds = array<i64: 8, 1024>}, {pipeline_mode = #tpu.pipeline_mode<synchronous>, transform_indices = @transform_1, window_bounds = array<i64: 1024, 128>}, {pipeline_mode = #tpu.pipeline_mode<synchronous>, transform_indices = @transform_2, window_bounds = array<i64: 1, 128>}, {transform_indices = @transform_3, window_bounds = array<i64: 8, 128>}]} {
    %c0 = arith.constant 0 : index
    %c0_0 = arith.constant 0 : index
    %0 = vector.load %arg1[%c0, %c0_0] : memref<8x1024xf32, #tpu.memory_space<vmem>>, vector<8x1024xf32>
    %1 = arith.truncf %0 : vector<8x1024xf32> to vector<8x1024xbf16>
    %c0_1 = arith.constant 0 : index
    %c0_2 = arith.constant 0 : index
    %2 = vector.load %arg2[%c0_1, %c0_2] : memref<1024x128xbf16, #tpu.memory_space<vmem>>, vector<1024x128xbf16>
    %cst = arith.constant dense<0.000000e+00> : vector<8x128xf32>
    %3 = tpu.matmul %1, %2, %cst {dimension_numbers = #tpu.dot_dimension_numbers<[1], [0], [0], [1], [0, 0, 1, 1], [], []>} : vector<8x1024xbf16>, vector<1024x128xbf16>, vector<8x128xf32> -> vector<8x128xf32>
    %c0_3 = arith.constant 0 : index
    %c0_4 = arith.constant 0 : index
    %4 = vector.load %arg3[%c0_3, %c0_4] : memref<1x128xf32, #tpu.memory_space<vmem>>, vector<1x128xf32>
    %5 = vector.broadcast %4 : vector<1x128xf32> to vector<8x128xf32>
    %6 = arith.addf %3, %5 : vector<8x128xf32>
    %c0_5 = arith.constant 0 : index
    %c0_6 = arith.constant 0 : index
    %7 = vector.load %arg4[%c0_5, %c0_6] : memref<8x128xf32, #tpu.memory_space<vmem>>, vector<8x128xf32>
    tpu.vector_store %arg4[%c0_5, %c0_6], %6 {strides = array<i32>} : memref<8x128xf32, #tpu.memory_space<vmem>>, vector<8x128xf32>,
    return
  }
  func.func @transform_0(%arg0: i32) -> (i32, i32) {
    %c0_i32 = arith.constant 0 : i32
    %c0_i32_0 = arith.constant 0 : i32
    return %arg0, %c0_i32 : i32, i32
  }
  func.func @transform_1(%arg0: i32) -> (i32, i32) {
    %c0_i32 = arith.constant 0 : i32
    %c0_i32_0 = arith.constant 0 : i32
    %c0_i32_1 = arith.constant 0 : i32
    return %c0_i32, %c0_i32_0 : i32, i32
  }
  func.func @transform_2(%arg0: i32) -> (i32, i32) {
    %c0_i32 = arith.constant 0 : i32
    %c0_i32_0 = arith.constant 0 : i32
    %c0_i32_1 = arith.constant 0 : i32
    return %c0_i32, %c0_i32_0 : i32, i32
  }
  func.func @transform_3(%arg0: i32) -> (i32, i32) {
    %c0_i32 = arith.constant 0 : i32
    %c0_i32_0 = arith.constant 0 : i32
    return %arg0, %c0_i32 : i32, i32
  }
}

</mosaic_0001>

<bundles_post_ra>
// kernel: classifier_forward.1
= control target key start
LH: loop header
LB: loop body
LE: loop exit
PB: predicated region body
PF: predicated region fallthrough
CT: control target
= control target key end

     0   :  { %8 = vsyncpa [#allocation3], 0  ;;  %s974_s12 = smov [#allocation2]   ;;  %s1039_s0 = inlined_call_operand.vmem [shape: f32[8,1024], index: 0, kind: input, shape index: {}]   ;;  %s1040_s1 = inlined_call_operand.hbm [shape: bf16[1024,128], index: 1, kind: input, shape index: {}]   ;;  %s1041_s2 = inlined_call_operand.vmem [shape: f32[1,128], index: 2, kind: input, shape index: {}]   ;;  %s1042_s3 = inlined_call_operand.vmem [shape: f32[8,128], index: 3, kind: output, shape index: {}]  }
   0x1   :  { %s16_s13 = sshll.u32 %s974_s12, 4  ;;  %s950_s16 = scalar_lea.hbm %s1040_s1, 8192  ;;  %s17_s13 = int_to_ptr.vmem [resolvable:$true] %s16_s13 }
   0x2   :  { %p951_p0 = scmp.ne.s32.totalorder %s1040_s1, %s950_s16  ;;  %p954_p1 = scmp.lt.u32.totalorder %s950_s16, %s1040_s1 }
   0x4   :  { %p956_p2 = pnand %p954_p1, %p951_p0 }
   0x6   :  { %959 = shalt.err (!%p956_p2)
}
   0x7   :  { %s960_s21 = scalar_lea.vmem %s17_s13, 8192  ;;  %p965_p4 = scmp.lt.s32.totalorder %s17_s13, %s17_s13 }
   0x8   :  { %p961_p3 = scmp.ne.s32.totalorder %s17_s13, %s960_s21  ;;  %p966_p5 = scmp.lt.s32.totalorder %s960_s21, %s960_s21 }
   0xa   :  { %p967_p6 = por %p966_p5, %p965_p4 }
   0xc   :  { %p968_p7 = pnand %p967_p6, %p961_p3 }
   0xe   :  { %971 = shalt.err (!%p968_p7)
}
   0xf   :  { %s975_s22 = smov 64   ;;  %s976_s23 = smov 4  }
  0x10   :  { %22 = dma.hbm_to_vmem [thread:$0]  %s1040_s1, 8192, %s17_s13, [#allocation3], %s975_s22, %s975_s22, %s976_s23  }
  0x11   :  { %972 = dma.done.wait [#allocation3], 8192  }
  0x12   :  { %973 = vsyncadd [#allocation3], 4294959104  ;;  %v886_v0 = vld [vmem:[#allocation2 + $0x40] sm:$0xff]   ;;  %v890_v4 = vld [vmem:[#allocation2 + $0x48] sm:$0xff]  }
  0x13   :  { %v887_v1 = vld [vmem:[#allocation2 + $0xc0] sm:$0xff]   ;;  %795 = vmatprep.subr.bf16.mxu0 %v886_v0  ;;  %v891_v5 = vld [vmem:[#allocation2 + $0xc8] sm:$0xff]   ;;  %v894_v8 = vld [vmem:[#allocation2 + $0x50] sm:$0xff]  }
  0x14   :  { %v888_v2 = vld [vmem:[#allocation2] sm:$0xff]   ;;  %817 = vmatprep.subr.bf16.mxu1 %v887_v1  ;;  %v892_v6 = vld [vmem:[#allocation2 + $0x8] sm:$0xff]   ;;  %v895_v9 = vld [vmem:[#allocation2 + $0xd0] sm:$0xff]  }
  0x15   :  { %v889_v3 = vld [vmem:[#allocation2 + $0x80] sm:$0xff]   ;;  %796 = vmatpush3.bf16.msra.mxu0 %v888_v2  ;;  %v893_v7 = vld [vmem:[#allocation2 + $0x88] sm:$0xff]   ;;  %v896_v10 = vld [vmem:[#allocation2 + $0x10] sm:$0xff]  }
  0x16   :  { %818 = vmatpush3.bf16.msra.mxu1 %v889_v3  ;;  %797 = vmatprep.subr.bf16.mxu0 %v890_v4  ;;  %v897_v11 = vld [vmem:[#allocation2 + $0x90] sm:$0xff]   ;;  %v898_v12 = vld [vmem:[#allocation2 + $0x58] sm:$0xff]   ;;  %v902_v16 = vld [vmem:[#allocation2 + $0x60] sm:$0xff]  }
  0x17   :  { %819 = vmatprep.subr.bf16.mxu1 %v891_v5  ;;  %v899_v13 = vld [vmem:[#allocation2 + $0xd8] sm:$0xff]   ;;  %v903_v17 = vld [vmem:[#allocation2 + $0xe0] sm:$0xff]   ;;  %v906_v20 = vld [vmem:[#allocation2 + $0x68] sm:$0xff]  }
  0x18   :  { %v900_v14 = vld [vmem:[#allocation2 + $0x18] sm:$0xff]   ;;  %v904_v18 = vld [vmem:[#allocation2 + $0x20] sm:$0xff]   ;;  %v907_v21 = vld [vmem:[#allocation2 + $0xe8] sm:$0xff]  }
  0x19   :  { %798 = vmatpush3.bf16.msra.mxu0 %v892_v6  ;;  %v901_v15 = vld [vmem:[#allocation2 + $0x98] sm:$0xff]   ;;  %v905_v19 = vld [vmem:[#allocation2 + $0xa0] sm:$0xff]   ;;  %v908_v22 = vld [vmem:[#allocation2 + $0x28] sm:$0xff]  }
  0x1a   :  { %820 = vmatpush3.bf16.msra.mxu1 %v893_v7  ;;  %799 = vmatprep.subr.bf16.mxu0 %v894_v8  ;;  %v909_v23 = vld [vmem:[#allocation2 + $0xa8] sm:$0xff]   ;;  %v910_v24 = vld [vmem:[#allocation2 + $0x70] sm:$0xff]   ;;  %v914_v28 = vld [vmem:[#allocation2 + $0x78] sm:$0xff]  }
  0x1b   :  { %821 = vmatprep.subr.bf16.mxu1 %v895_v9  ;;  %v911_v25 = vld [vmem:[#allocation2 + $0xf0] sm:$0xff]   ;;  %v915_v29 = vld [vmem:[#allocation2 + $0xf8] sm:$0xff]   ;;  %v30_v32 = vld [vmem:[%s1039_s0 + $0x8] sm:$0xff] }
  0x1c   :  { %v912_v26 = vld [vmem:[#allocation2 + $0x30] sm:$0xff]   ;;  %v916_v30 = vld [vmem:[#allocation2 + $0x38] sm:$0xff]   ;;  %v29_v34 = vld [vmem:[%s1039_s0] sm:$0xff]  ;;  %v38_v35 = vpack.c.bf16 %v30_v32, %v30_v32 }
  0x1d   :  { %800 = vmatpush3.bf16.msra.mxu0 %v896_v10  ;;  %v913_v27 = vld [vmem:[#allocation2 + $0xb0] sm:$0xff]   ;;  %v917_v31 = vld [vmem:[#allocation2 + $0xb8] sm:$0xff]   ;;  %v37_v37 = vpack.c.bf16 %v29_v34, %v29_v34  ;;  %v918_v40 = vld [vmem:[#allocation2 + $0x140] sm:$0xff]  }
  0x1e   :  { %822 = vmatpush3.bf16.msra.mxu1 %v897_v11  ;;  %801 = vmatprep.subr.bf16.mxu0 %v898_v12  ;;  %v32_v33 = vld [vmem:[%s1039_s0 + $0x18] sm:$0xff]  ;;  %v31_v38 = vld [vmem:[%s1039_s0 + $0x10] sm:$0xff]  ;;  %v919_v41 = vld [vmem:[#allocation2 + $0x1c0] sm:$0xff]  }
  0x1f   :  { %823 = vmatprep.subr.bf16.mxu1 %v899_v13  ;;  %v40_v36 = vpack.c.bf16 %v32_v33, %v32_v33  ;;  %v39_v39 = vpack.c.bf16 %v31_v38, %v31_v38  ;;  %596 = vmatprep.mubr.bf16.mxu0 %v38_v35  ;;  %v920_v42 = vld [vmem:[#allocation2 + $0x100] sm:$0xff]   ;;  %v922_v44 = vld [vmem:[#allocation2 + $0x148] sm:$0xff]   ;;  %v926_v48 = vld [vmem:[#allocation2 + $0x150] sm:$0xff]  }
  0x20   :  { %v921_v43 = vld [vmem:[#allocation2 + $0x180] sm:$0xff]   ;;  %v923_v45 = vld [vmem:[#allocation2 + $0x1c8] sm:$0xff]   ;;  %v927_v49 = vld [vmem:[#allocation2 + $0x1d0] sm:$0xff]  }
  0x21   :  { %802 = vmatpush3.bf16.msra.mxu0 %v900_v14  ;;  %636 = vmatprep.mubr.bf16.mxu1 %v40_v36  ;;  %v924_v46 = vld [vmem:[#allocation2 + $0x108] sm:$0xff]   ;;  %v928_v50 = vld [vmem:[#allocation2 + $0x110] sm:$0xff]   ;;  %v930_v52 = vld [vmem:[#allocation2 + $0x158] sm:$0xff]  }
  0x22   :  { %824 = vmatpush3.bf16.msra.mxu1 %v901_v15  ;;  %803 = vmatprep.subr.bf16.mxu0 %v902_v16  ;;  %v925_v47 = vld [vmem:[#allocation2 + $0x188] sm:$0xff]   ;;  %v929_v51 = vld [vmem:[#allocation2 + $0x190] sm:$0xff]   ;;  %v931_v53 = vld [vmem:[#allocation2 + $0x1d8] sm:$0xff]  }
  0x23   :  { %825 = vmatprep.subr.bf16.mxu1 %v903_v17  ;;  %v932_v54 = vld [vmem:[#allocation2 + $0x118] sm:$0xff]   ;;  %v934_v56 = vld [vmem:[#allocation2 + $0x160] sm:$0xff]   ;;  %v938_v60 = vld [vmem:[#allocation2 + $0x168] sm:$0xff]  }
  0x24   :  { %v933_v55 = vld [vmem:[#allocation2 + $0x198] sm:$0xff]   ;;  %v935_v57 = vld [vmem:[#allocation2 + $0x1e0] sm:$0xff]   ;;  %v939_v61 = vld [vmem:[#allocation2 + $0x1e8] sm:$0xff]  }
  0x25   :  { %804 = vmatpush3.bf16.msra.mxu0 %v904_v18  ;;  %v936_v58 = vld [vmem:[#allocation2 + $0x120] sm:$0xff]   ;;  %v940_v62 = vld [vmem:[#allocation2 + $0x128] sm:$0xff]   ;;  %v942_v0 = vld [vmem:[#allocation2 + $0x170] sm:$0xff]  }
  0x26   :  { %826 = vmatpush3.bf16.msra.mxu1 %v905_v19  ;;  %805 = vmatprep.subr.bf16.mxu0 %v906_v20  ;;  %v937_v59 = vld [vmem:[#allocation2 + $0x1a0] sm:$0xff]   ;;  %v941_v63 = vld [vmem:[#allocation2 + $0x1a8] sm:$0xff]   ;;  %v943_v1 = vld [vmem:[#allocation2 + $0x1f0] sm:$0xff]  }
  0x27   :  { %827 = vmatprep.subr.bf16.mxu1 %v907_v21  ;;  %v944_v2 = vld [vmem:[#allocation2 + $0x130] sm:$0xff]   ;;  %v946_v4 = vld [vmem:[#allocation2 + $0x178] sm:$0xff]   ;;  %v34_v8 = vld [vmem:[%s1039_s0 + $0x28] sm:$0xff] }
  0x28   :  { %v945_v3 = vld [vmem:[#allocation2 + $0x1b0] sm:$0xff]   ;;  %v947_v5 = vld [vmem:[#allocation2 + $0x1f8] sm:$0xff]   ;;  %v42_v10 = vpack.c.bf16 %v34_v8, %v34_v8  ;;  %v33_v12 = vld [vmem:[%s1039_s0 + $0x20] sm:$0xff] }
  0x29   :  { %806 = vmatpush3.bf16.msra.mxu0 %v908_v22  ;;  %v948_v6 = vld [vmem:[#allocation2 + $0x138] sm:$0xff]   ;;  %v35_v13 = vld [vmem:[%s1039_s0 + $0x30] sm:$0xff]  ;;  %v41_v14 = vpack.c.bf16 %v33_v12, %v33_v12  ;;  %v730_v18 = vld [vmem:[%s1041_s2] ss:$0 sm:$0xff] }
  0x2a   :  { %828 = vmatpush3.bf16.msra.mxu1 %v909_v23  ;;  %807 = vmatprep.subr.bf16.mxu0 %v910_v24  ;;  %v949_v7 = vld [vmem:[#allocation2 + $0x1b8] sm:$0xff]   ;;  %v43_v15 = vpack.c.bf16 %v35_v13, %v35_v13 }
  0x2b   :  { %829 = vmatprep.subr.bf16.mxu1 %v911_v25  ;;  %v36_v9 = vld [vmem:[%s1039_s0 + $0x38] sm:$0xff] }
  0x2c   :  { %v44_v11 = vpack.c.bf16 %v36_v9, %v36_v9 }
  0x2d   :  { %808 = vmatpush3.bf16.msra.mxu0 %v912_v26 }
  0x2e   :  { %830 = vmatpush3.bf16.msra.mxu1 %v913_v27  ;;  %809 = vmatprep.subr.bf16.mxu0 %v914_v28 }
  0x2f   :  { %831 = vmatprep.subr.bf16.mxu1 %v915_v29 }
  0x31   :  { %810 = vmatpush3.bf16.msra.mxu0 %v916_v30 }
  0x32   :  { %832 = vmatpush3.bf16.msra.mxu1 %v917_v31  ;;  %839 = vmatprep.subr.bf16.mxu0 %v918_v40 }
  0x33   :  { %861 = vmatprep.subr.bf16.mxu1 %v919_v41 }
  0x34   :  { %597 = vmatmul.mubr.bf16.vlgmr.msra.gmra.mrb[0].mxu0 %v37_v37 }
  0x35   :  { %637 = vmatmul.mubr.bf16.vlgmr.msra.gmra.mrb[0].mxu1 %v39_v39  ;;  %840 = vmatpush3.bf16.msra.mxu0 %v920_v42 }
  0x36   :  { %862 = vmatpush3.bf16.msra.mxu1 %v921_v43  ;;  %841 = vmatprep.subr.bf16.mxu0 %v922_v44 }
  0x37   :  { %863 = vmatprep.subr.bf16.mxu1 %v923_v45  ;;  %676 = vmatprep.mubr.bf16.mxu0 %v42_v10 }
  0x38   :  { %716 = vmatprep.mubr.bf16.mxu1 %v44_v11 }
  0x39   :  { %842 = vmatpush3.bf16.msra.mxu0 %v924_v46 }
  0x3a   :  { %864 = vmatpush3.bf16.msra.mxu1 %v925_v47  ;;  %843 = vmatprep.subr.bf16.mxu0 %v926_v48 }
  0x3b   :  { %865 = vmatprep.subr.bf16.mxu1 %v927_v49 }
  0x3d   :  { %844 = vmatpush3.bf16.msra.mxu0 %v928_v50 }
  0x3e   :  { %866 = vmatpush3.bf16.msra.mxu1 %v929_v51  ;;  %845 = vmatprep.subr.bf16.mxu0 %v930_v52 }
  0x3f   :  { %867 = vmatprep.subr.bf16.mxu1 %v931_v53 }
  0x41   :  { %846 = vmatpush3.bf16.msra.mxu0 %v932_v54 }
  0x42   :  { %868 = vmatpush3.bf16.msra.mxu1 %v933_v55  ;;  %847 = vmatprep.subr.bf16.mxu0 %v934_v56 }
  0x43   :  { %869 = vmatprep.subr.bf16.mxu1 %v935_v57 }
  0x45   :  { %848 = vmatpush3.bf16.msra.mxu0 %v936_v58 }
  0x46   :  { %870 = vmatpush3.bf16.msra.mxu1 %v937_v59  ;;  %849 = vmatprep.subr.bf16.mxu0 %v938_v60 }
  0x47   :  { %871 = vmatprep.subr.bf16.mxu1 %v939_v61 }
  0x49   :  { %850 = vmatpush3.bf16.msra.mxu0 %v940_v62 }
  0x4a   :  { %872 = vmatpush3.bf16.msra.mxu1 %v941_v63  ;;  %851 = vmatprep.subr.bf16.mxu0 %v942_v0 }
  0x4b   :  { %873 = vmatprep.subr.bf16.mxu1 %v943_v1 }
  0x4d   :  { %852 = vmatpush3.bf16.msra.mxu0 %v944_v2 }
  0x4e   :  { %874 = vmatpush3.bf16.msra.mxu1 %v945_v3  ;;  %853 = vmatprep.subr.bf16.mxu0 %v946_v4 }
  0x4f   :  { %875 = vmatprep.subr.bf16.mxu1 %v947_v5 }
  0x51   :  { %854 = vmatpush3.bf16.msra.mxu0 %v948_v6 }
  0x52   :  { %876 = vmatpush3.bf16.msra.mxu1 %v949_v7 }
  0x54   :  { %677 = vmatmul.mubr.bf16.vlgmr.msra.gmra.mrb[4].mxu0 %v41_v14 }
  0x55   :  { %717 = vmatmul.mubr.bf16.vlgmr.msra.gmra.mrb[4].mxu1 %v43_v15 }
 0x107   :  { %v811_v16 = vpop.f32.mrb[0].mxu0 }
 0x108   :  { %v833_v17 = vpop.f32.mrb[0].mxu1  ;;  %v812_v19 = vpop.f32.mrb[1].mxu0 }
 0x109   :  { %v834_v20 = vpop.f32.mrb[1].mxu1  ;;  %v813_v21 = vadd.f32 %v812_v19, %v811_v16  ;;  %v814_v23 = vpop.f32.mrb[2].mxu0 }
 0x10a   :  { %v835_v22 = vadd.f32 %v834_v20, %v833_v17  ;;  %v836_v24 = vpop.f32.mrb[2].mxu1  ;;  %v815_v25 = vpop.f32.mrb[3].mxu0 }
 0x10b   :  { %v837_v26 = vpop.f32.mrb[3].mxu1  ;;  %v599_v27 = vadd.f32 %v813_v21, %v730_v18 }
 0x10d   :  { %v639_v28 = vadd.f32 %v835_v22, %v599_v27 }
 0x127   :  { %v855_v29 = vpop.f32.mrb[4].mxu0 }
 0x128   :  { %v877_v30 = vpop.f32.mrb[4].mxu1  ;;  %v856_v31 = vpop.f32.mrb[5].mxu0 }
 0x129   :  { %v857_v32 = vadd.f32 %v856_v31, %v855_v29  ;;  %v878_v33 = vpop.f32.mrb[5].mxu1  ;;  %v858_v34 = vpop.f32.mrb[6].mxu0 }
 0x12a   :  { %v879_v35 = vadd.f32 %v878_v33, %v877_v30  ;;  %v880_v36 = vpop.f32.mrb[6].mxu1  ;;  %v859_v37 = vpop.f32.mrb[7].mxu0 }
 0x12b   :  { %v679_v38 = vadd.f32 %v857_v32, %v639_v28  ;;  %v881_v39 = vpop.f32.mrb[7].mxu1 }
 0x12d   :  { %v719_v40 = vadd.f32 %v879_v35, %v679_v38 }
 0x12f   :  { %724 = vst [vmem:[%s1042_s3] sm:$0xff] %v719_v40 }
 0x130   :  { %729 = vsyncpa [#allocation3], 1 }

</bundles_post_ra>
